<compile_context>
chip_gen: v7x
topology: tpu7x:2x2x1
jax: 0.10.0
libtpu: 0.0.40
codegen_flags: <defaults>
</compile_context>

<pallas_src>
import functools

import jax
import jax.numpy as jnp
from jax.experimental import pallas as pl
from jax.experimental.pallas import tpu as pltpu

INPUT_SIZE = 6
F_PAD = 8            # input features padded to a sublane multiple
HIDDEN_SIZE = 64
OUTPUT_SIZE = 10     # forecast_steps


def _round_up(n, m):
    return ((n + m - 1) // m) * m


def _device_kind():
    try:
        return jax.devices()[0].device_kind.lower()
    except Exception:  # pragma: no cover - defensive
        return ""


def _is_v5e(kind):
    return ("v5 lite" in kind) or ("v5e" in kind) or ("v5litepod" in kind)


# ----------------------------------------------------------------------------
# Kernel
# ----------------------------------------------------------------------------
def pinn_kernel(x_ref, w1_ref, b1_ref, w2_ref, b2_ref, w3_ref, b3_ref,
                w4_ref, b4_ref, o_ref, *, tanh_dtype):
    # x_ref: [F_PAD, TILE_B] (batch on lanes); weights [out, in]; biases [out, 1] f32.
    cdt = w2_ref.dtype  # matmul operand dtype (bf16 or f32); accumulation is f32.

    def layer(w_ref, b_ref, h):
        z = jnp.dot(w_ref[...], h, preferred_element_type=jnp.float32) + b_ref[...]
        # tanh in bf16 on v6e/v7x (bf16 EUP), f32 on v5e / exact path.
        return jnp.tanh(z.astype(tanh_dtype)).astype(cdt)

    h = layer(w1_ref, b1_ref, x_ref[...])     # fc1 + tanh   (dropout = identity)
    h = layer(w2_ref, b2_ref, h)              # fc2 + tanh
    h = layer(w3_ref, b3_ref, h)              # fc3 + tanh
    # fc4 (no activation), output in f32.
    o_ref[...] = (jnp.dot(w4_ref[...], h, preferred_element_type=jnp.float32)
                  + b4_ref[...]).astype(o_ref.dtype)


# ----------------------------------------------------------------------------
# pallas_call wrapper (feature-major core)
# ----------------------------------------------------------------------------
def _plan(B, compute_dtype, max_tile_b, tanh_dtype):
    kind = _device_kind()
    is_v5e = _is_v5e(kind)
    if max_tile_b is None:
        # v5e + f32 intermediates: smaller tile to ease its single vector-store slot.
        max_tile_b = 512 if (is_v5e and compute_dtype == jnp.float32) else 2048
    if tanh_dtype is None:
        tanh_dtype = (jnp.bfloat16
                      if (compute_dtype == jnp.bfloat16 and not is_v5e)
                      else jnp.float32)
    # Multiple of 128 lanes; guarantee >= 2 grid steps for B > 128 so the
    # "parallel" batch axis can shard across v7x's two TensorCores.
    tile_b = min(max_tile_b, max(128, _round_up(pl.cdiv(max(B, 1), 2), 128)))
    grid_b = pl.cdiv(max(B, 1), tile_b)
    b_pad = grid_b * tile_b
    return tanh_dtype, tile_b, grid_b, b_pad


def _pinn_pallas(x_t, params, *, compute_dtype, tanh_dtype, tile_b):
    """x_t: [F_PAD, b_pad] in compute_dtype (b_pad % tile_b == 0) -> [OUTPUT_SIZE, b_pad] f32."""
    w1, b1, w2, b2, w3, b3, w4, b4 = params
    b_pad = x_t.shape[1]
    grid_b = b_pad // tile_b

    # Zero-pad w1's input dim to F_PAD; cast matmul operands once (biases stay f32).
    w1p = jnp.pad(w1, ((0, 0), (0, F_PAD - INPUT_SIZE))).astype(compute_dtype)
    w2c, w3c, w4c = (w.astype(compute_dtype) for w in (w2, w3, w4))

    const2d = lambda i: (0, 0)
    in_specs = [
        pl.BlockSpec((F_PAD, tile_b), lambda i: (0, i)),          # x tile (pipelined)
        pl.BlockSpec((HIDDEN_SIZE, F_PAD), const2d),              # w1 (resident)
        pl.BlockSpec((HIDDEN_SIZE, 1), const2d),                  # b1
        pl.BlockSpec((HIDDEN_SIZE, HIDDEN_SIZE), const2d),        # w2
        pl.BlockSpec((HIDDEN_SIZE, 1), const2d),                  # b2
        pl.BlockSpec((HIDDEN_SIZE, HIDDEN_SIZE), const2d),        # w3
        pl.BlockSpec((HIDDEN_SIZE, 1), const2d),                  # b3
        pl.BlockSpec((OUTPUT_SIZE, HIDDEN_SIZE), const2d),        # w4
        pl.BlockSpec((OUTPUT_SIZE, 1), const2d),                  # b4
    ]
    out_spec = pl.BlockSpec((OUTPUT_SIZE, tile_b), lambda i: (0, i))

    itemsize = 2 if compute_dtype == jnp.bfloat16 else 4
    weight_elems = (HIDDEN_SIZE * F_PAD + 2 * HIDDEN_SIZE * HIDDEN_SIZE
                    + OUTPUT_SIZE * HIDDEN_SIZE)
    bias_elems = 3 * HIDDEN_SIZE + OUTPUT_SIZE
    cost = pl.CostEstimate(
        flops=2 * b_pad * (F_PAD * HIDDEN_SIZE + 2 * HIDDEN_SIZE * HIDDEN_SIZE
                           + HIDDEN_SIZE * OUTPUT_SIZE),
        transcendentals=3 * HIDDEN_SIZE * b_pad,
        bytes_accessed=(F_PAD * b_pad * itemsize + OUTPUT_SIZE * b_pad * 4
                        + weight_elems * itemsize + bias_elems * 4),
    )

    kernel = functools.partial(pinn_kernel, tanh_dtype=tanh_dtype)
    return pl.pallas_call(
        kernel,
        out_shape=jax.ShapeDtypeStruct((OUTPUT_SIZE, b_pad), jnp.float32),
        grid=(grid_b,),
        in_specs=in_specs,
        out_specs=out_spec,
        compiler_params=pltpu.CompilerParams(
            dimension_semantics=("parallel",)),
        cost_estimate=cost,
    )(x_t, w1p, b1, w2c, b2, w3c, b3, w4c, b4)


# ----------------------------------------------------------------------------
# Public entry points
# ----------------------------------------------------------------------------
def pinn_forward_feature_major(x_fm, params, *, compute_dtype=jnp.bfloat16,
                               max_tile_b=None, tanh_dtype=None):
    """Feature-major path: x_fm [INPUT_SIZE, B] -> [OUTPUT_SIZE, B] (no transpose passes)."""
    F, B = x_fm.shape
    assert F == INPUT_SIZE
    tanh_dtype, tile_b, _, b_pad = _plan(B, compute_dtype, max_tile_b, tanh_dtype)
    # Single fused pad (rows to F_PAD, lanes to b_pad).  Padded batch lanes compute
    # tanh(bias) garbage that is sliced off below — harmless.
    x_t = jnp.zeros((F_PAD, b_pad), compute_dtype).at[:INPUT_SIZE, :B].set(
        x_fm.astype(compute_dtype))
    out_t = _pinn_pallas(x_t, params, compute_dtype=compute_dtype,
                         tanh_dtype=tanh_dtype, tile_b=tile_b)
    return out_t[:, :B]


def pinn_forward(x, params, *, compute_dtype=jnp.bfloat16, max_tile_b=None,
                 tanh_dtype=None):
    """Batch-major convenience wrapper: x [B, INPUT_SIZE] f32 -> [B, OUTPUT_SIZE] f32."""
    return pinn_forward_feature_major(
        x.T, params, compute_dtype=compute_dtype, max_tile_b=max_tile_b,
        tanh_dtype=tanh_dtype).T


# ----------------------------------------------------------------------------
# Params / reference
# ----------------------------------------------------------------------------
def init_params(key):
    """nn.Linear-style init U(-1/sqrt(fan_in), 1/sqrt(fan_in)); W [out,in], b [out,1]."""
    def linear(key, fan_in, fan_out):
        kw, kb = jax.random.split(key)
        bound = 1.0 / jnp.sqrt(float(fan_in))
        w = jax.random.uniform(kw, (fan_out, fan_in), jnp.float32, -bound, bound)
        b = jax.random.uniform(kb, (fan_out, 1), jnp.float32, -bound, bound)
        return w, b

    k1, k2, k3, k4 = jax.random.split(key, 4)
    w1, b1 = linear(k1, INPUT_SIZE, HIDDEN_SIZE)
    w2, b2 = linear(k2, HIDDEN_SIZE, HIDDEN_SIZE)
    w3, b3 = linear(k3, HIDDEN_SIZE, HIDDEN_SIZE)
    w4, b4 = linear(k4, HIDDEN_SIZE, OUTPUT_SIZE)
    return (w1, b1, w2, b2, w3, b3, w4, b4)


def pinn_reference(x, params):
    (w1, b1, w2, b2, w3, b3, w4, b4) = params
    h = jnp.tanh(x @ w1.T + b1.T)
    h = jnp.tanh(h @ w2.T + b2.T)
    h = jnp.tanh(h @ w3.T + b3.T)
    return h @ w4.T + b4.T


if __name__ == "__main__":
    key = jax.random.PRNGKey(0)
    kx, kp = jax.random.split(key)
    params = init_params(kp)

    # Small smoke test (B=8).
    B = 8
    x = jax.random.normal(kx, (B, INPUT_SIZE), jnp.float32)
    ref = pinn_reference(x, params)

    # Default path: bf16 MXU operands (bf16 tanh on v6e/v7x, f32 tanh on v5e).
    out = jax.block_until_ready(pinn_forward(x, params))
    assert out.shape == (B, OUTPUT_SIZE)
    assert jnp.allclose(out, ref, atol=1e-1, rtol=5e-2)

    # Exact f32 path (f32 operands, f32 tanh) -> tight tolerance.
    out_f32 = jax.block_until_ready(
        pinn_forward(x, params, compute_dtype=jnp.float32))
    assert jnp.allclose(out_f32, ref, atol=2e-5, rtol=2e-5)

    # Feature-major entry (no wrapper transpose passes).
    out_fm = jax.block_until_ready(
        pinn_forward_feature_major(x.T, params, compute_dtype=jnp.float32))
    assert out_fm.shape == (OUTPUT_SIZE, B)
    assert jnp.allclose(out_fm.T, ref, atol=2e-5, rtol=2e-5)

    # Multi-tile grid + ragged-batch padding path (B=300 -> 2 tiles of 256 lanes).
    B2 = 300
    x2 = jax.random.normal(kx, (B2, INPUT_SIZE), jnp.float32)
    ref2 = pinn_reference(x2, params)
    out2 = jax.block_until_ready(
        pinn_forward(x2, params, compute_dtype=jnp.float32))
    assert out2.shape == (B2, OUTPUT_SIZE)
    assert jnp.allclose(out2, ref2, atol=2e-5, rtol=2e-5)

    out2_bf16 = jax.block_until_ready(pinn_forward(x2, params))
    assert out2_bf16.shape == (B2, OUTPUT_SIZE)
    assert jnp.allclose(out2_bf16, ref2, atol=1e-1, rtol=5e-2)

    print("KERNEL_OK")
</pallas_src>

<mosaic_0001>
module attributes {stable_mosaic.version = 11 : i64} {
  func.func @pinn_kernel(%arg0: i32, %arg1: memref<8x128xbf16, #tpu.memory_space<vmem>>, %arg2: memref<64x8xbf16, #tpu.memory_space<vmem>>, %arg3: memref<64x1xf32, #tpu.memory_space<vmem>>, %arg4: memref<64x64xbf16, #tpu.memory_space<vmem>>, %arg5: memref<64x1xf32, #tpu.memory_space<vmem>>, %arg6: memref<64x64xbf16, #tpu.memory_space<vmem>>, %arg7: memref<64x1xf32, #tpu.memory_space<vmem>>, %arg8: memref<10x64xbf16, #tpu.memory_space<vmem>>, %arg9: memref<10x1xf32, #tpu.memory_space<vmem>>, %arg10: memref<10x128xf32, #tpu.memory_space<vmem>>) attributes {dimension_semantics = [#tpu.dimension_semantics<parallel>], iteration_bounds = array<i64: 1>, scalar_prefetch = 0 : i64, scratch_operands = 0 : i64, tpu.core_type = #tpu.core_type<tc>, window_params = [{transform_indices = @transform_0, window_bounds = array<i64: 8, 128>}, {pipeline_mode = #tpu.pipeline_mode<synchronous>, transform_indices = @transform_1, window_bounds = array<i64: 64, 8>}, {pipeline_mode = #tpu.pipeline_mode<synchronous>, transform_indices = @transform_2, window_bounds = array<i64: 64, 1>}, {pipeline_mode = #tpu.pipeline_mode<synchronous>, transform_indices = @transform_3, window_bounds = array<i64: 64, 64>}, {pipeline_mode = #tpu.pipeline_mode<synchronous>, transform_indices = @transform_4, window_bounds = array<i64: 64, 1>}, {pipeline_mode = #tpu.pipeline_mode<synchronous>, transform_indices = @transform_5, window_bounds = array<i64: 64, 64>}, {pipeline_mode = #tpu.pipeline_mode<synchronous>, transform_indices = @transform_6, window_bounds = array<i64: 64, 1>}, {pipeline_mode = #tpu.pipeline_mode<synchronous>, transform_indices = @transform_7, window_bounds = array<i64: 10, 64>}, {pipeline_mode = #tpu.pipeline_mode<synchronous>, transform_indices = @transform_8, window_bounds = array<i64: 10, 1>}, {transform_indices = @transform_9, window_bounds = array<i64: 10, 128>}]} {
    %c0 = arith.constant 0 : index
    %c0_0 = arith.constant 0 : index
    %0 = vector.load %arg1[%c0, %c0_0] : memref<8x128xbf16, #tpu.memory_space<vmem>>, vector<8x128xbf16>
    %c0_1 = arith.constant 0 : index
    %c0_2 = arith.constant 0 : index
    %1 = vector.load %arg2[%c0_1, %c0_2] : memref<64x8xbf16, #tpu.memory_space<vmem>>, vector<64x8xbf16>
    %cst = arith.constant dense<0.000000e+00> : vector<64x128xf32>
    %2 = tpu.matmul %1, %0, %cst {dimension_numbers = #tpu.dot_dimension_numbers<[1], [0], [0], [1], [0, 0, 1, 1], [], []>} : vector<64x8xbf16>, vector<8x128xbf16>, vector<64x128xf32> -> vector<64x128xf32>
    %c0_3 = arith.constant 0 : index
    %c0_4 = arith.constant 0 : index
    %3 = vector.load %arg3[%c0_3, %c0_4] : memref<64x1xf32, #tpu.memory_space<vmem>>, vector<64x1xf32>
    %4 = vector.broadcast %3 : vector<64x1xf32> to vector<64x128xf32>
    %5 = arith.addf %2, %4 : vector<64x128xf32>
    %6 = arith.truncf %5 : vector<64x128xf32> to vector<64x128xbf16>
    %7 = math.tanh %6 : vector<64x128xbf16>
    %c0_5 = arith.constant 0 : index
    %c0_6 = arith.constant 0 : index
    %8 = vector.load %arg4[%c0_5, %c0_6] : memref<64x64xbf16, #tpu.memory_space<vmem>>, vector<64x64xbf16>
    %cst_7 = arith.constant dense<0.000000e+00> : vector<64x128xf32>
    %9 = tpu.matmul %8, %7, %cst_7 {dimension_numbers = #tpu.dot_dimension_numbers<[1], [0], [0], [1], [0, 0, 1, 1], [], []>} : vector<64x64xbf16>, vector<64x128xbf16>, vector<64x128xf32> -> vector<64x128xf32>
    %c0_8 = arith.constant 0 : index
    %c0_9 = arith.constant 0 : index
    %10 = vector.load %arg5[%c0_8, %c0_9] : memref<64x1xf32, #tpu.memory_space<vmem>>, vector<64x1xf32>
    %11 = vector.broadcast %10 : vector<64x1xf32> to vector<64x128xf32>
    %12 = arith.addf %9, %11 : vector<64x128xf32>
    %13 = arith.truncf %12 : vector<64x128xf32> to vector<64x128xbf16>
    %14 = math.tanh %13 : vector<64x128xbf16>
    %c0_10 = arith.constant 0 : index
    %c0_11 = arith.constant 0 : index
    %15 = vector.load %arg6[%c0_10, %c0_11] : memref<64x64xbf16, #tpu.memory_space<vmem>>, vector<64x64xbf16>
    %cst_12 = arith.constant dense<0.000000e+00> : vector<64x128xf32>
    %16 = tpu.matmul %15, %14, %cst_12 {dimension_numbers = #tpu.dot_dimension_numbers<[1], [0], [0], [1], [0, 0, 1, 1], [], []>} : vector<64x64xbf16>, vector<64x128xbf16>, vector<64x128xf32> -> vector<64x128xf32>
    %c0_13 = arith.constant 0 : index
    %c0_14 = arith.constant 0 : index
    %17 = vector.load %arg7[%c0_13, %c0_14] : memref<64x1xf32, #tpu.memory_space<vmem>>, vector<64x1xf32>
    %18 = vector.broadcast %17 : vector<64x1xf32> to vector<64x128xf32>
    %19 = arith.addf %16, %18 : vector<64x128xf32>
    %20 = arith.truncf %19 : vector<64x128xf32> to vector<64x128xbf16>
    %21 = math.tanh %20 : vector<64x128xbf16>
    %c0_15 = arith.constant 0 : index
    %c0_16 = arith.constant 0 : index
    %22 = vector.load %arg8[%c0_15, %c0_16] : memref<10x64xbf16, #tpu.memory_space<vmem>>, vector<10x64xbf16>
    %cst_17 = arith.constant dense<0.000000e+00> : vector<10x128xf32>
    %23 = tpu.matmul %22, %21, %cst_17 {dimension_numbers = #tpu.dot_dimension_numbers<[1], [0], [0], [1], [0, 0, 1, 1], [], []>} : vector<10x64xbf16>, vector<64x128xbf16>, vector<10x128xf32> -> vector<10x128xf32>
    %c0_18 = arith.constant 0 : index
    %c0_19 = arith.constant 0 : index
    %24 = vector.load %arg9[%c0_18, %c0_19] : memref<10x1xf32, #tpu.memory_space<vmem>>, vector<10x1xf32>
    %25 = vector.broadcast %24 : vector<10x1xf32> to vector<10x128xf32>
    %26 = arith.addf %23, %25 : vector<10x128xf32>
    %c0_20 = arith.constant 0 : index
    %c0_21 = arith.constant 0 : index
    %27 = vector.load %arg10[%c0_20, %c0_21] : memref<10x128xf32, #tpu.memory_space<vmem>>, vector<10x128xf32>
    tpu.vector_store %arg10[%c0_20, %c0_21], %26 {strides = array<i32>} : memref<10x128xf32, #tpu.memory_space<vmem>>, vector<10x128xf32>,
    return
  }
  func.func @transform_0(%arg0: i32) -> (i32, i32) {
    %c0_i32 = arith.constant 0 : i32
    %c0_i32_0 = arith.constant 0 : i32
    return %c0_i32, %arg0 : i32, i32
  }
  func.func @transform_1(%arg0: i32) -> (i32, i32) {
    %c0_i32 = arith.constant 0 : i32
    %c0_i32_0 = arith.constant 0 : i32
    %c0_i32_1 = arith.constant 0 : i32
    return %c0_i32, %c0_i32_0 : i32, i32
  }
  func.func @transform_2(%arg0: i32) -> (i32, i32) {
    %c0_i32 = arith.constant 0 : i32
    %c0_i32_0 = arith.constant 0 : i32
    %c0_i32_1 = arith.constant 0 : i32
    return %c0_i32, %c0_i32_0 : i32, i32
  }
  func.func @transform_3(%arg0: i32) -> (i32, i32) {
    %c0_i32 = arith.constant 0 : i32
    %c0_i32_0 = arith.constant 0 : i32
    %c0_i32_1 = arith.constant 0 : i32
    return %c0_i32, %c0_i32_0 : i32, i32
  }
  func.func @transform_4(%arg0: i32) -> (i32, i32) {
    %c0_i32 = arith.constant 0 : i32
    %c0_i32_0 = arith.constant 0 : i32
    %c0_i32_1 = arith.constant 0 : i32
    return %c0_i32, %c0_i32_0 : i32, i32
  }
  func.func @transform_5(%arg0: i32) -> (i32, i32) {
    %c0_i32 = arith.constant 0 : i32
    %c0_i32_0 = arith.constant 0 : i32
    %c0_i32_1 = arith.constant 0 : i32
    return %c0_i32, %c0_i32_0 : i32, i32
  }
  func.func @transform_6(%arg0: i32) -> (i32, i32) {
    %c0_i32 = arith.constant 0 : i32
    %c0_i32_0 = arith.constant 0 : i32
    %c0_i32_1 = arith.constant 0 : i32
    return %c0_i32, %c0_i32_0 : i32, i32
  }
  func.func @transform_7(%arg0: i32) -> (i32, i32) {
    %c0_i32 = arith.constant 0 : i32
    %c0_i32_0 = arith.constant 0 : i32
    %c0_i32_1 = arith.constant 0 : i32
    return %c0_i32, %c0_i32_0 : i32, i32
  }
  func.func @transform_8(%arg0: i32) -> (i32, i32) {
    %c0_i32 = arith.constant 0 : i32
    %c0_i32_0 = arith.constant 0 : i32
    %c0_i32_1 = arith.constant 0 : i32
    return %c0_i32, %c0_i32_0 : i32, i32
  }
  func.func @transform_9(%arg0: i32) -> (i32, i32) {
    %c0_i32 = arith.constant 0 : i32
    %c0_i32_0 = arith.constant 0 : i32
    return %c0_i32, %arg0 : i32, i32
  }
}

</mosaic_0001>

<bundles_post_ra>
// kernel: tpu_custom_call.1
= control target key start
LH: loop header
LB: loop body
LE: loop exit
PB: predicated region body
PF: predicated region fallthrough
CT: control target
= control target key end

     0   :  { %vm124_vm0 = vcmask 1043456   ;;  %vm111_vm1 = vcmask 64512   ;;  %v781_v5 = vmov 0   ;;  %s982_s0 = inlined_call_operand.vmem [shape: bf16[8,128], index: 0, kind: input, shape index: {}]   ;;  %s983_s1 = inlined_call_operand.vmem [shape: bf16[64,8], index: 1, kind: input, shape index: {}]   ;;  %s984_s2 = inlined_call_operand.vmem [shape: f32[64,1], index: 2, kind: input, shape index: {}]   ;;  %s985_s3 = inlined_call_operand.vmem [shape: bf16[64,64], index: 3, kind: input, shape index: {}]   ;;  %s986_s4 = inlined_call_operand.vmem [shape: f32[64,1], index: 4, kind: input, shape index: {}]   ;;  %s987_s5 = inlined_call_operand.vmem [shape: bf16[64,64], index: 5, kind: input, shape index: {}]   ;;  %s988_s6 = inlined_call_operand.vmem [shape: f32[64,1], index: 6, kind: input, shape index: {}]   ;;  %s989_s7 = inlined_call_operand.vmem [shape: bf16[10,64], index: 7, kind: input, shape index: {}]   ;;  %s990_s8 = inlined_call_operand.vmem [shape: f32[10,1], index: 8, kind: input, shape index: {}]   ;;  %s991_s9 = inlined_call_operand.hbm [shape: f32[10,128], index: 9, kind: output, shape index: {}]  }
   0x1   :  { %v34_v0 = vld [vmem:[%s982_s0] sm:$0xf]  ;;  %v721_v3 = vld [vmem:[%s983_s1 + $0x8] sm:$0xff]   ;;  %v722_v4 = vld [vmem:[%s983_s1 + $0x10] sm:$0xff]   ;;  %718 = vset.pattern.permute.xlu0 %v781_v5  ;;  %719 = vset.pattern.permute.xlu1 %v781_v5 }
   0x2   :  { %v720_v1 = vld [vmem:[%s983_s1] sm:$0xff]   ;;  %711 = vmatprep.subr.msk.bf16.mxu0 %vm124_vm0, %v34_v0  ;;  %v126_v2 = vsel %vm124_vm0, %v34_v0, 0  ;;  %v45_v7 = vld [vmem:[%s984_s2 + $0x10] sm:$0xff]  ;;  %v44_v8 = vld [vmem:[%s984_s2 + $0x8] sm:$0xff] }
   0x3   :  { %658 = vmatpush3.bf16.msra.mxu0 %v126_v2  ;;  %659 = vmatprep.mubr.msk.bf16.mxu0 %vm111_vm1, %v720_v1  ;;  %v43_v6 = vld [vmem:[%s984_s2] sm:$0xff]  ;;  %v46_v9 = vld [vmem:[%s984_s2 + $0x18] sm:$0xff]  ;;  %v48_v12 = vld [vmem:[%s984_s2 + $0x28] sm:$0xff] }
   0x4   :  { %53 = vperm.xlu0 %718, %v43_v6   ;;  %63 = vperm.xlu1 %719, %v45_v7   ;;  %v723_v10 = vld [vmem:[%s983_s1 + $0x18] sm:$0xff]   ;;  %v47_v11 = vld [vmem:[%s984_s2 + $0x20] sm:$0xff]  ;;  %v49_v13 = vld [vmem:[%s984_s2 + $0x30] sm:$0xff] }
   0x5   :  { %v50_v14 = vld [vmem:[%s984_s2 + $0x38] sm:$0xff]  ;;  %v209_v15 = vld [vmem:[%s986_s4] sm:$0xff]  ;;  %v210_v16 = vld [vmem:[%s986_s4 + $0x8] sm:$0xff] }
   0x6   :  { %660 = vmatmul.mubr.msk.bf16.vlgmr.msra.gmra.mrb[0].mxu0 %vm111_vm1, %v721_v3 }
   0x7   :  { %663 = vmatprep.mubr.msk.bf16.mxu0 %vm111_vm1, %v722_v4 }
   0x8   :  { %58 = vperm.xlu0 %718, %v44_v8   ;;  %68 = vperm.xlu1 %719, %v46_v9  }
   0xc   :  { %73 = vperm.xlu0 %718, %v47_v11   ;;  %78 = vperm.xlu1 %719, %v48_v12  }
   0xe   :  { %664 = vmatmul.mubr.msk.bf16.gmra.mrb[4].mxu0 %vm111_vm1, %v723_v10 }
  0x10   :  { %83 = vperm.xlu0 %718, %v49_v13   ;;  %88 = vperm.xlu1 %719, %v50_v14  }
  0x11   :  { %14 = vsyncpa [#allocation3], 0  ;;  %v211_v17 = vld [vmem:[%s986_s4 + $0x10] sm:$0xff]  ;;  %v212_v18 = vld [vmem:[%s986_s4 + $0x18] sm:$0xff]  ;;  %vm277_vm2 = vcmask 523264   ;;  %vm783_vm3 = vmmov 0  }
  0x12   :  { %v213_v19 = vld [vmem:[%s986_s4 + $0x20] sm:$0xff]  ;;  %v214_v20 = vld [vmem:[%s986_s4 + $0x28] sm:$0xff]  ;;  %v215_v21 = vld [vmem:[%s986_s4 + $0x30] sm:$0xff]  ;;  %s784_s1 = smov [#allocation2]  }
  0x13   :  { %v216_v22 = vld [vmem:[%s986_s4 + $0x38] sm:$0xff]  ;;  %v371_v23 = vld [vmem:[%s988_s6] sm:$0xff]  ;;  %v372_v24 = vld [vmem:[%s988_s6 + $0x8] sm:$0xff]  ;;  %s594_s13 = sshll.u32 %s784_s1, 4  ;;  %s595_s13 = int_to_ptr.vmem [resolvable:$true] %s594_s13 }
  0x14   :  { %219 = vperm.xlu0 %718, %v209_v15   ;;  %224 = vperm.xlu1 %719, %v210_v16   ;;  %v373_v25 = vld [vmem:[%s988_s6 + $0x10] sm:$0xff]  ;;  %v374_v26 = vld [vmem:[%s988_s6 + $0x18] sm:$0xff]  ;;  %v375_v27 = vld [vmem:[%s988_s6 + $0x20] sm:$0xff]  ;;  %s757_s14 = scalar_lea.vmem %s595_s13, 256  ;;  %p762_p1 = scmp.lt.s32.totalorder %s595_s13, %s595_s13 }
  0x15   :  { %v376_v28 = vld [vmem:[%s988_s6 + $0x28] sm:$0xff]  ;;  %v377_v29 = vld [vmem:[%s988_s6 + $0x30] sm:$0xff]  ;;  %v378_v30 = vld [vmem:[%s988_s6 + $0x38] sm:$0xff]  ;;  %p758_p0 = scmp.ne.s32.totalorder %s595_s13, %s757_s14  ;;  %p763_p2 = scmp.lt.s32.totalorder %s757_s14, %s757_s14 }
  0x16   :  { %v526_v31 = vld [vmem:[%s990_s8] sm:$0xff]  ;;  %v527_v32 = vld [vmem:[%s990_s8 + $0x8] sm:$0x3]  ;;  %v726_v3 = vld [vmem:[%s985_s3 + $0x10] sm:$0xff]  }
  0x17   :  { %v724_v33 = vld [vmem:[%s985_s3] sm:$0xff]   ;;  %v725_v2 = vld [vmem:[%s985_s3 + $0x8] sm:$0xff]   ;;  %v727_v4 = vld [vmem:[%s985_s3 + $0x18] sm:$0xff]   ;;  %p764_p3 = por %p763_p2, %p762_p1 }
  0x18   :  { %229 = vperm.xlu0 %718, %v211_v17   ;;  %234 = vperm.xlu1 %719, %v212_v18   ;;  %v728_v5 = vld [vmem:[%s987_s5] sm:$0xff]  }
  0x19   :  { %675 = vmatprep.mubr.msk.bf16.mxu1 %vm277_vm2, %v724_v33  ;;  %691 = vmatprep.mubr.msk.bf16.mxu0 %vm277_vm2, %v728_v5  ;;  %p765_p4 = pnand %p764_p3, %p758_p0 }
  0x1c   :  { %239 = vperm.xlu0 %718, %v213_v19   ;;  %244 = vperm.xlu1 %719, %v214_v20  }
  0x20   :  { %249 = vperm.xlu0 %718, %v215_v21   ;;  %254 = vperm.xlu1 %719, %v216_v22  }
  0x24   :  { %381 = vperm.xlu0 %718, %v371_v23   ;;  %386 = vperm.xlu1 %719, %v372_v24  }
  0x28   :  { %391 = vperm.xlu0 %718, %v373_v25   ;;  %396 = vperm.xlu1 %719, %v374_v26  }
  0x2c   :  { %401 = vperm.xlu0 %718, %v375_v27   ;;  %406 = vperm.xlu1 %719, %v376_v28  }
  0x30   :  { %411 = vperm.xlu0 %718, %v377_v29   ;;  %416 = vperm.xlu1 %719, %v378_v30  }
  0x34   :  { %530 = vperm.xlu0 %718, %v526_v31   ;;  %535 = vperm.xlu1 %719, %v527_v32  }
  0x83   :  { %v54_v34 = vpop.permute.xlu0 %53  ;;  %v64_v35 = vpop.permute.xlu1 %63 }
  0x87   :  { %v59_v36 = vpop.permute.xlu0 %58  ;;  %v69_v37 = vpop.permute.xlu1 %68 }
  0x8b   :  { %v74_v41 = vpop.permute.xlu0 %73  ;;  %v79_v45 = vpop.permute.xlu1 %78 }
  0x8f   :  { %v84_v51 = vpop.permute.xlu0 %83  ;;  %v89_v53 = vpop.permute.xlu1 %88 }
  0x93   :  { %v220_v6 = vpop.permute.xlu0 %219  ;;  %v225_v7 = vpop.permute.xlu1 %224 }
  0x97   :  { %v230_v8 = vpop.permute.xlu0 %229  ;;  %v235_v9 = vpop.permute.xlu1 %234 }
  0x9b   :  { %v240_v13 = vpop.permute.xlu0 %239  ;;  %v245_v17 = vpop.permute.xlu1 %244 }
  0x9f   :  { %v250_v23 = vpop.permute.xlu0 %249  ;;  %v255_v25 = vpop.permute.xlu1 %254 }
  0xd9   :  { %v661_v38 = vpop.f32.mrb[0].mxu0 }
  0xda   :  { %v162_v39 = vpop.f32.mrb[1].mxu0  ;;  %v171_v42 = vadd.f32 %v661_v38, %v64_v35  ;;  %v729_v38 = vld [vmem:[%s987_s5 + $0x8] sm:$0xff]  }
  0xdb   :  { %v662_v40 = vpop.f32.mrb[2].mxu0  ;;  %v163_v46 = vadd.f32 %v162_v39, %v54_v34  ;;  %v730_v39 = vld [vmem:[%s987_s5 + $0x10] sm:$0xff]  }
  0xdc   :  { %v174_v43 = vadd.f32 %v662_v40, %v69_v37  ;;  %v165_v44 = vpop.f32.mrb[3].mxu0  ;;  %v731_v40 = vld [vmem:[%s987_s5 + $0x18] sm:$0xff]  }
  0xdd   :  { %v166_v47 = vadd.f32 %v165_v44, %v59_v36 }
  0xde   :  { %v194_v48 = vpack.c.bf16 %v174_v43, %v171_v42  ;;  %v382_v42 = vpop.permute.xlu0 %381  ;;  %v387_v43 = vpop.permute.xlu1 %386 }
  0xdf   :  { %v193_v49 = vpack.c.bf16 %v166_v47, %v163_v46 }
  0xe1   :  { %733 = vtanh.bf16 %v193_v49  ;;  %v665_v50 = vpop.f32.mrb[4].mxu0 }
  0xe2   :  { %v178_v52 = vpop.f32.mrb[5].mxu0  ;;  %735 = vtanh.bf16 %v194_v48  ;;  %v187_v55 = vadd.f32 %v665_v50, %v84_v51  ;;  %v392_v44 = vpop.permute.xlu0 %391 }
  0xe3   :  { %v666_v54 = vpop.f32.mrb[6].mxu0  ;;  %v179_v58 = vadd.f32 %v178_v52, %v74_v41  ;;  %v782_v41 = vmov 0.0  }
  0xe4   :  { %v190_v56 = vadd.f32 %v666_v54, %v89_v53  ;;  %v181_v57 = vpop.f32.mrb[7].mxu0 }
  0xe5   :  { %v182_v59 = vadd.f32 %v181_v57, %v79_v45  ;;  %v397_v45 = vpop.permute.xlu1 %396 }
  0xe6   :  { %v196_v60 = vpack.c.bf16 %v190_v56, %v187_v55  ;;  %v402_v49 = vpop.permute.xlu0 %401 }
  0xe7   :  { %v195_v61 = vpack.c.bf16 %v182_v59, %v179_v58 }
  0xe9   :  { %737 = vtanh.bf16 %v195_v61  ;;  %v407_v53 = vpop.permute.xlu1 %406 }
  0xea   :  { %739 = vtanh.bf16 %v196_v60  ;;  %v412_v59 = vpop.permute.xlu0 %411 }
  0xec   :  { %v734_v62 = vpop.eup %733 }
  0xed   :  { %667 = vmatprep.subr.bf16.mxu1 %v734_v62  ;;  %v736_v63 = vpop.eup %735  ;;  %v417_v61 = vpop.permute.xlu1 %416 }
  0xee   :  { %668 = vmatpush3.bf16.msra.mxu1 %v734_v62 }
  0xef   :  { %669 = vmatprep.subr.bf16.mxu1 %v736_v63 }
  0xf2   :  { %670 = vmatpush3.bf16.msra.mxu1 %v736_v63 }
  0xf4   :  { %v738_v0 = vpop.eup %737 }
  0xf5   :  { %671 = vmatprep.subr.bf16.mxu1 %v738_v0  ;;  %v740_v1 = vpop.eup %739 }
  0xf6   :  { %672 = vmatpush3.bf16.msra.mxu1 %v738_v0 }
  0xf7   :  { %673 = vmatprep.subr.bf16.mxu1 %v740_v1 }
  0xfa   :  { %674 = vmatpush3.bf16.msra.mxu1 %v740_v1 }
  0xfb   :  { %699 = vmatprep.subr.bf16.mxu1 %v782_v41 }
  0xfd   :  { %676 = vmatmul.mubr.msk.bf16.vlgmr.msra.gmra.mrb[0].mxu1 %vm277_vm2, %v725_v2 }
  0xfe   :  { %679 = vmatprep.mubr.msk.bf16.mxu1 %vm277_vm2, %v726_v3 }
 0x105   :  { %680 = vmatmul.mubr.msk.bf16.gmra.mrb[4].mxu1 %vm277_vm2, %v727_v4 }
 0x106   :  { %707 = vmatprep.mubr.msk.bf16.mxu1 %vm783_vm3, %v782_v41 }
 0x1d0   :  { %v677_v10 = vpop.f32.mrb[0].mxu1 }
 0x1d1   :  { %v324_v11 = vpop.f32.mrb[1].mxu1  ;;  %v333_v14 = vadd.f32 %v677_v10, %v230_v8  ;;  %v732_v10 = vld [vmem:[%s989_s7] sm:$0x1f]  }
 0x1d2   :  { %v678_v12 = vpop.f32.mrb[2].mxu1  ;;  %v325_v18 = vadd.f32 %v324_v11, %v220_v6  ;;  %v531_v11 = vpop.permute.xlu0 %530 }
 0x1d3   :  { %v336_v15 = vadd.f32 %v678_v12, %v235_v9  ;;  %v327_v16 = vpop.f32.mrb[3].mxu1 }
 0x1d4   :  { %v328_v19 = vadd.f32 %v327_v16, %v225_v7 }
 0x1d5   :  { %v356_v20 = vpack.c.bf16 %v336_v15, %v333_v14  ;;  %v536_v15 = vpop.permute.xlu1 %535 }
 0x1d6   :  { %v355_v21 = vpack.c.bf16 %v328_v19, %v325_v18 }
 0x1d8   :  { %741 = vtanh.bf16 %v355_v21  ;;  %v681_v22 = vpop.f32.mrb[4].mxu1 }
 0x1d9   :  { %v340_v24 = vpop.f32.mrb[5].mxu1  ;;  %743 = vtanh.bf16 %v356_v20  ;;  %v349_v27 = vadd.f32 %v681_v22, %v250_v23 }
 0x1da   :  { %v682_v26 = vpop.f32.mrb[6].mxu1  ;;  %v341_v30 = vadd.f32 %v340_v24, %v240_v13 }
 0x1db   :  { %v352_v28 = vadd.f32 %v682_v26, %v255_v25  ;;  %v343_v29 = vpop.f32.mrb[7].mxu1 }
 0x1dc   :  { %v344_v31 = vadd.f32 %v343_v29, %v245_v17 }
 0x1dd   :  { %v358_v32 = vpack.c.bf16 %v352_v28, %v349_v27 }
 0x1de   :  { %v357_v33 = vpack.c.bf16 %v344_v31, %v341_v30 }
 0x1e0   :  { %745 = vtanh.bf16 %v357_v33 }
 0x1e1   :  { %747 = vtanh.bf16 %v358_v32 }
 0x1e3   :  { %v742_v34 = vpop.eup %741 }
 0x1e4   :  { %683 = vmatprep.subr.bf16.mxu0 %v742_v34  ;;  %v744_v35 = vpop.eup %743 }
 0x1e5   :  { %684 = vmatpush3.bf16.msra.mxu0 %v742_v34 }
 0x1e6   :  { %685 = vmatprep.subr.bf16.mxu0 %v744_v35 }
 0x1e9   :  { %686 = vmatpush3.bf16.msra.mxu0 %v744_v35 }
 0x1eb   :  { %v746_v36 = vpop.eup %745 }
 0x1ec   :  { %687 = vmatprep.subr.bf16.mxu0 %v746_v36  ;;  %v748_v37 = vpop.eup %747 }
 0x1ed   :  { %688 = vmatpush3.bf16.msra.mxu0 %v746_v36 }
 0x1ee   :  { %689 = vmatprep.subr.bf16.mxu0 %v748_v37 }
 0x1f1   :  { %690 = vmatpush3.bf16.msra.mxu0 %v748_v37 }
 0x1f4   :  { %692 = vmatmul.mubr.msk.bf16.vlgmr.msra.gmra.mrb[8].mxu0 %vm277_vm2, %v729_v38 }
 0x1f5   :  { %695 = vmatprep.mubr.msk.bf16.mxu0 %vm277_vm2, %v730_v39 }
 0x1fc   :  { %696 = vmatmul.mubr.msk.bf16.gmra.mrb[12].mxu0 %vm277_vm2, %v731_v40 }
 0x2c7   :  { %v693_v46 = vpop.f32.mrb[8].mxu0 }
 0x2c8   :  { %v485_v47 = vpop.f32.mrb[9].mxu0  ;;  %v494_v50 = vadd.f32 %v693_v46, %v392_v44 }
 0x2c9   :  { %v694_v48 = vpop.f32.mrb[10].mxu0  ;;  %v486_v54 = vadd.f32 %v485_v47, %v382_v42 }
 0x2ca   :  { %v497_v51 = vadd.f32 %v694_v48, %v397_v45  ;;  %v488_v52 = vpop.f32.mrb[11].mxu0 }
 0x2cb   :  { %v489_v55 = vadd.f32 %v488_v52, %v387_v43 }
 0x2cc   :  { %v517_v56 = vpack.c.bf16 %v497_v51, %v494_v50 }
 0x2cd   :  { %v516_v57 = vpack.c.bf16 %v489_v55, %v486_v54 }
 0x2cf   :  { %749 = vtanh.bf16 %v516_v57  ;;  %v697_v58 = vpop.f32.mrb[12].mxu0 }
 0x2d0   :  { %v501_v60 = vpop.f32.mrb[13].mxu0  ;;  %v510_v63 = vadd.f32 %v697_v58, %v412_v59  ;;  %751 = vtanh.bf16 %v517_v56 }
 0x2d1   :  { %v698_v62 = vpop.f32.mrb[14].mxu0  ;;  %v502_v2 = vadd.f32 %v501_v60, %v402_v49 }
 0x2d2   :  { %v513_v0 = vadd.f32 %v698_v62, %v417_v61  ;;  %v504_v1 = vpop.f32.mrb[15].mxu0 }
 0x2d3   :  { %v505_v3 = vadd.f32 %v504_v1, %v407_v53 }
 0x2d4   :  { %v519_v4 = vpack.c.bf16 %v513_v0, %v510_v63 }
 0x2d5   :  { %v518_v5 = vpack.c.bf16 %v505_v3, %v502_v2 }
 0x2d7   :  { %753 = vtanh.bf16 %v518_v5 }
 0x2d8   :  { %755 = vtanh.bf16 %v519_v4 }
 0x2da   :  { %v750_v6 = vpop.eup %749 }
 0x2db   :  { %700 = vmatpush3.bf16.msra.mxu1 %v750_v6  ;;  %v752_v7 = vpop.eup %751 }
 0x2dc   :  { %701 = vmatprep.subr.bf16.mxu1 %v782_v41 }
 0x2df   :  { %702 = vmatpush3.bf16.msra.mxu1 %v752_v7 }
 0x2e0   :  { %703 = vmatprep.subr.bf16.mxu1 %v782_v41 }
 0x2e2   :  { %v754_v8 = vpop.eup %753 }
 0x2e3   :  { %704 = vmatpush3.bf16.msra.mxu1 %v754_v8  ;;  %v756_v9 = vpop.eup %755 }
 0x2e4   :  { %705 = vmatprep.subr.bf16.mxu1 %v782_v41 }
 0x2e7   :  { %706 = vmatpush3.bf16.msra.mxu1 %v756_v9 }
 0x2ea   :  { %708 = vmatmul.mubr.msk.bf16.vlgmr.msra.gmra.mrb[8].mxu1 %vm277_vm2, %v732_v10 }
 0x3bd   :  { %v580_v12 = vpop.f32.mrb[8].mxu1 }
 0x3be   :  { %v581_v13 = vadd.f32 %v580_v12, %v531_v11  ;;  %v709_v14 = vpop.f32.mrb[9].mxu1 }
 0x3bf   :  { %v583_v16 = vpop.f32.mrb[10].mxu1 }
 0x3c0   :  { %587 = vst [vmem:[#allocation2] sm:$0xff] %v581_v13  ;;  %v584_v17 = vadd.f32 %v583_v16, %v536_v15  ;;  %v710_v18 = vpop.f32.mrb[11].mxu1 }
 0x3c2   :  { %588 = vst [vmem:[#allocation2 + $0x8] sm:$0x3] %v584_v17 }
 0x3c3   :  { %768 = shalt.err (!%p765_p4)
}
 0x3c4   :  { %s769_s16 = scalar_lea.hbm %s991_s9, 256 }
 0x3c5   :  { %p770_p5 = scmp.ne.s32.totalorder %s991_s9, %s769_s16  ;;  %p773_p6 = scmp.lt.u32.totalorder %s769_s16, %s991_s9 }
 0x3c7   :  { %p775_p7 = pnand %p773_p6, %p770_p5 }
 0x3c9   :  { %778 = shalt.err (!%p775_p7)
}
 0x3ca   :  { %s785_s19 = smov 128   ;;  %s786_s20 = smov 8  }
 0x3cb   :  { %600 = dma.vmem_to_hbm [thread:$0]  %s595_s13, 256, %s991_s9, [#allocation3], %s785_s19, %s785_s19, %s786_s20  }
 0x3cc   :  { %779 = dma.done.wait [#allocation3], 256  }
 0x3cd   :  { %780 = vsyncadd [#allocation3], 4294967040 }
 0x3ce   :  { %604 = vsyncpa [#allocation3], 1 }

</bundles_post_ra>
